<compile_context>
chip_gen: v7x
topology: tpu7x:2x2x1
jax: 0.10.0
libtpu: 0.0.40
codegen_flags: <defaults>
</compile_context>

<pallas_src>
import math

import jax
import jax.numpy as jnp
from jax.experimental import pallas as pl
from jax.experimental.pallas import tpu as pltpu


def _round_up(n, m):
    return ((n + m - 1) // m) * m


# ----------------------------------------------------------------------------
# Kernel bodies
# ----------------------------------------------------------------------------
def _make_per_m_kernel(n_blocks, k_sizes, o_sizes, compute_dtype):
    """One edge tile, one MXU matmul per m, result stored straight into its
    output lane slice (no concat epilogue)."""

    def kernel(*refs):
        x_ref = refs[0]
        w_refs = refs[1:1 + n_blocks]
        b0_ref = refs[1 + n_blocks]
        o_ref = refs[2 + n_blocks]

        x = x_ref[...]                           # (e_tile, Kin)
        if x.dtype != compute_dtype:
            x = x.astype(compute_dtype)          # hoisted: once per edge tile

        off_i = 0
        off_o = 0
        for mi in range(n_blocks):
            k = k_sizes[mi]
            o = o_sizes[mi]
            y = jnp.dot(x[:, off_i:off_i + k], w_refs[mi][...],
                        preferred_element_type=jnp.float32)
            if mi == 0:
                y = y + b0_ref[...]              # fc_m0 bias, f32
            # store this m-block now: frees vregs, wide store overlaps next matmul
            o_ref[:, off_o:off_o + o] = y.astype(o_ref.dtype)
            off_i += k
            off_o += o

    return kernel


def _make_block_diag_kernel(compute_dtype):
    """Small / non-128-aligned configs: all m-blocks folded into one
    block-diagonal weight -> a single lane-dense matmul + full-width bias."""

    def kernel(x_ref, w_ref, b_ref, o_ref):
        x = x_ref[...]
        if x.dtype != compute_dtype:
            x = x.astype(compute_dtype)
        y = jnp.dot(x, w_ref[...], preferred_element_type=jnp.float32)
        y = y + b_ref[...]                       # bias zero outside the m=0 block
        o_ref[...] = y.astype(o_ref.dtype)

    return kernel


# ----------------------------------------------------------------------------
# pallas_call wrapper
# ----------------------------------------------------------------------------
def so2_convolution_fused(x_flat, w_list, bias_2d, k_sizes, o_sizes, *,
                          compute_dtype, block_diag, out_dtype=None, e_tile=512):
    """x_flat: (E, sum(k_sizes)).
    per-m mode:      w_list[i]: (k_sizes[i], o_sizes[i]); bias_2d: (1, o_sizes[0]).
    block-diag mode: w_list[0]: (Kin, Out) block-diagonal; bias_2d: (1, Out).
    Returns (E, sum(o_sizes)) in out_dtype (default: dtype of x_flat)."""
    E, Kin = x_flat.shape
    assert Kin == sum(k_sizes), (Kin, k_sizes)
    Out = sum(o_sizes)
    out_dtype = x_flat.dtype if out_dtype is None else out_dtype

    # Edge tile: multiple of 8 sublanes, no larger than needed; if the grid would
    # collapse to a single step for a non-trivial E, split so both v7x TCs work.
    e_tile_eff = _round_up(max(min(int(e_tile), E), 8), 8)
    if E > 256 and pl.cdiv(E, e_tile_eff) < 2:
        e_tile_eff = _round_up(pl.cdiv(E, 2), 8)
    grid = (pl.cdiv(E, e_tile_eff),)             # ragged tail masked by Pallas

    if block_diag:
        kernel = _make_block_diag_kernel(compute_dtype)
        weights = (w_list[0],)
    else:
        kernel = _make_per_m_kernel(len(w_list), tuple(k_sizes), tuple(o_sizes),
                                    compute_dtype)
        weights = tuple(w_list)

    in_specs = [pl.BlockSpec((e_tile_eff, Kin), lambda i: (i, 0))]
    for w in weights:
        # Full-array blocks + constant index_map -> weights stay VMEM-resident.
        in_specs.append(pl.BlockSpec(w.shape, lambda i: (0, 0)))
    in_specs.append(pl.BlockSpec(bias_2d.shape, lambda i: (0, 0)))

    # Explicit VMEM budget: double-buffered x tile + double-buffered out tile
    # + resident weights/bias, clipped to a value valid on v5e/v6e/v7x.
    in_b = jnp.dtype(x_flat.dtype).itemsize
    out_b = jnp.dtype(out_dtype).itemsize
    w_bytes = sum(int(w.size) * jnp.dtype(w.dtype).itemsize for w in weights)
    w_bytes += int(bias_2d.size) * jnp.dtype(bias_2d.dtype).itemsize
    budget = (2 * e_tile_eff * Kin * in_b + 2 * e_tile_eff * Out * out_b
              + 2 * w_bytes + (2 << 20))
    vmem_limit = int(min(max(budget, 16 << 20), 64 << 20))

    return pl.pallas_call(
        kernel,
        out_shape=jax.ShapeDtypeStruct((E, Out), out_dtype),
        grid=grid,
        in_specs=in_specs,
        out_specs=pl.BlockSpec((e_tile_eff, Out), lambda i: (i, 0)),
        compiler_params=pltpu.CompilerParams(
            dimension_semantics=("parallel",),   # v7x: shard edge tiles over 2 TCs
            vmem_limit_bytes=vmem_limit),
    )(x_flat, *weights, bias_2d)


# ----------------------------------------------------------------------------
# SO2_Convolution module (parameter setup + glue in plain JAX)
# ----------------------------------------------------------------------------
class SO2ConvolutionPallas:
    def __init__(self, sphere_channels, m_output_channels, lmax, mmax, key, *,
                 compute_dtype=jnp.bfloat16, mode="auto"):
        self.sphere_channels = sphere_channels
        self.m_output_channels = m_output_channels
        self.lmax = lmax
        self.mmax = mmax
        self.compute_dtype = compute_dtype

        C, Cout = sphere_channels, m_output_channels
        # mappingReduced.m_size[m] = lmax - m + 1
        self.m_size = [lmax - m + 1 for m in range(mmax + 1)]
        self.m_split_sizes = [self.m_size[0]] + [2 * s for s in self.m_size[1:]]

        # ---- canonical f32 parameters (mirror the PyTorch layer shapes) ----
        K0 = (lmax + 1) * C
        O0 = Cout * (K0 // C)
        key, k_w0, k_b0 = jax.random.split(key, 3)
        self.w0 = jax.random.normal(k_w0, (O0, K0), jnp.float32) / math.sqrt(K0)
        self.b0 = 0.01 * jax.random.normal(k_b0, (O0,), jnp.float32)

        self.wm = []
        for m in range(1, mmax + 1):
            K = (lmax - m + 1) * C
            H = Cout * (lmax - m + 1)
            key, km = jax.random.split(key)
            w = jax.random.normal(km, (2 * H, K), jnp.float32) / math.sqrt(K)
            self.wm.append(w * (1.0 / math.sqrt(2.0)))   # SO2_m_Conv 1/sqrt(2) scale

        # ---- fold the +m/-m complex combine into the per-m weights ----
        w_fused = [self.w0.T]                       # m = 0: x0 @ W0^T + b0
        k_sizes = [K0]
        o_sizes = [O0]
        for m in range(1, mmax + 1):
            w = self.wm[m - 1]
            H = w.shape[0] // 2
            wr_t, wi_t = w[:H].T, w[H:].T                         # (K, H) each
            top = jnp.concatenate([wr_t, wi_t], axis=1)           # (K, 2H)
            bot = jnp.concatenate([-wi_t, wr_t], axis=1)          # (K, 2H)
            w_fused.append(jnp.concatenate([top, bot], axis=0))   # (2K, 2H)
            k_sizes.append(2 * w.shape[1])
            o_sizes.append(2 * H)

        self.k_sizes = tuple(k_sizes)
        self.o_sizes = tuple(o_sizes)
        Kin, Out = sum(k_sizes), sum(o_sizes)

        aligned = (all(k % 128 == 0 for k in k_sizes)
                   and all(o % 128 == 0 for o in o_sizes))
        if mode == "auto":
            bd_ok = Kin * Out * jnp.dtype(compute_dtype).itemsize <= (8 << 20)
            self.block_diag = bd_ok and ((not aligned) or Kin <= 512)
        else:
            self.block_diag = (mode == "block_diag")

        if self.block_diag:
            # One block-diagonal (Kin, Out) weight + full-width bias (zero off m=0).
            wbd = jnp.zeros((Kin, Out), jnp.float32)
            oi = oo = 0
            for w, k, o in zip(w_fused, k_sizes, o_sizes):
                wbd = wbd.at[oi:oi + k, oo:oo + o].set(w)
                oi += k
                oo += o
            bias = jnp.zeros((Out,), jnp.float32).at[:o_sizes[0]].set(self.b0)
            self.kernel_weights = [wbd.astype(compute_dtype)]
            self.bias_2d = bias[None, :]
        else:
            self.kernel_weights = [w.astype(compute_dtype) for w in w_fused]
            self.bias_2d = self.b0[None, :].astype(jnp.float32)

    def __call__(self, x, x_edge, *, e_tile=512, out_dtype=None):
        # TODO(synk): rad_func path (internal_weights=False) not implemented.
        num_edges = x_edge.shape[0]
        x_flat = x.reshape(num_edges, -1)           # contiguous (E, M*C) slab
        out_flat = so2_convolution_fused(
            x_flat, self.kernel_weights, self.bias_2d, self.k_sizes, self.o_sizes,
            compute_dtype=self.compute_dtype, block_diag=self.block_diag,
            out_dtype=out_dtype, e_tile=e_tile)
        return out_flat.reshape(num_edges, -1, self.m_output_channels)


# ----------------------------------------------------------------------------
# Pure-JAX f32 reference (mirrors the PyTorch forward) for correctness checks
# ----------------------------------------------------------------------------
def reference_forward(mod, x):
    E = x.shape[0]
    Cout = mod.m_output_channels
    splits, start = [], 0
    for s in mod.m_split_sizes:
        splits.append(x[:, start:start + s, :])
        start += s
    x0 = splits[0].reshape(E, -1)
    out = [(x0 @ mod.w0.T + mod.b0).reshape(E, -1, Cout)]
    for m in range(1, mod.mmax + 1):
        L = mod.lmax - m + 1
        xm = splits[m].reshape(E, 2, L * mod.sphere_channels)
        y = jnp.einsum("ezk,ok->ezo", xm, mod.wm[m - 1])
        H = mod.wm[m - 1].shape[0] // 2
        x_r, x_i = y[..., :H], y[..., H:]
        x_m_r = x_r[:, 0] - x_i[:, 1]
        x_m_i = x_r[:, 1] + x_i[:, 0]
        out.append(x_m_r.reshape(E, -1, Cout))
        out.append(x_m_i.reshape(E, -1, Cout))
    return jnp.concatenate(out, axis=1)


# ----------------------------------------------------------------------------
if __name__ == "__main__":
    key = jax.random.PRNGKey(0)
    key, kx1, kx2, kp1, kp2 = jax.random.split(key, 5)

    lmax, mmax = 3, 2
    num_edges = 300           # deliberately NOT a multiple of any edge tile
    x_edge = jnp.zeros((num_edges, 4), jnp.float32)   # only its length is used

    # ---- config 1: small, non-128-aligned channels -> block-diagonal kernel ----
    C1 = Co1 = 8
    mod1 = SO2ConvolutionPallas(C1, Co1, lmax, mmax, kp1,
                                compute_dtype=jnp.bfloat16)
    assert mod1.block_diag
    m_total = sum(mod1.m_split_sizes)                 # 14 coefficients
    x1 = jax.random.normal(kx1, (num_edges, m_total, C1), jnp.float32)

    out1 = jax.block_until_ready(mod1(x1.astype(jnp.bfloat16), x_edge))  # bf16 I/O
    assert out1.shape == (num_edges, m_total, Co1), out1.shape
    assert out1.dtype == jnp.bfloat16, out1.dtype
    ref1 = reference_forward(mod1, x1)
    rel1 = jnp.linalg.norm(out1.astype(jnp.float32) - ref1) / jnp.linalg.norm(ref1)
    assert rel1 < 3e-2, float(rel1)

    # f32 compute / f32 I/O path with the same parameters
    mod1_f32 = SO2ConvolutionPallas(C1, Co1, lmax, mmax, kp1,
                                    compute_dtype=jnp.float32)
    out1_f32 = jax.block_until_ready(mod1_f32(x1, x_edge))
    assert out1_f32.dtype == jnp.float32
    rel1f = jnp.linalg.norm(out1_f32 - ref1) / jnp.linalg.norm(ref1)
    assert rel1f < 2e-2, float(rel1f)

    # ---- config 2: 128-aligned channels -> per-m kernel, direct per-block stores ----
    C2 = Co2 = 64
    mod2 = SO2ConvolutionPallas(C2, Co2, lmax, mmax, kp2,
                                compute_dtype=jnp.bfloat16)
    assert not mod2.block_diag
    x2 = jax.random.normal(kx2, (num_edges, m_total, C2), jnp.float32)

    # e_tile=128 -> 3 grid steps + masked ragged tail exercised
    out2 = jax.block_until_ready(mod2(x2.astype(jnp.bfloat16), x_edge, e_tile=128))
    assert out2.shape == (num_edges, m_total, Co2), out2.shape
    ref2 = reference_forward(mod2, x2)
    rel2 = jnp.linalg.norm(out2.astype(jnp.float32) - ref2) / jnp.linalg.norm(ref2)
    assert rel2 < 3e-2, float(rel2)

    print("KERNEL_OK")
</pallas_src>

<mosaic_0001>
module attributes {stable_mosaic.version = 11 : i64} {
  func.func @kernel(%arg0: i32, %arg1: memref<152x112xbf16, #tpu.memory_space<vmem>>, %arg2: memref<112x112xbf16, #tpu.memory_space<vmem>>, %arg3: memref<1x112xf32, #tpu.memory_space<vmem>>, %arg4: memref<152x112xbf16, #tpu.memory_space<vmem>>) attributes {dimension_semantics = [#tpu.dimension_semantics<parallel>], iteration_bounds = array<i64: 2>, scalar_prefetch = 0 : i64, scratch_operands = 0 : i64, tpu.core_type = #tpu.core_type<tc>, window_params = [{transform_indices = @transform_0, window_bounds = array<i64: 152, 112>}, {pipeline_mode = #tpu.pipeline_mode<synchronous>, transform_indices = @transform_1, window_bounds = array<i64: 112, 112>}, {pipeline_mode = #tpu.pipeline_mode<synchronous>, transform_indices = @transform_2, window_bounds = array<i64: 1, 112>}, {transform_indices = @transform_3, window_bounds = array<i64: 152, 112>}]} {
    %c0 = arith.constant 0 : index
    %c0_0 = arith.constant 0 : index
    %0 = vector.load %arg1[%c0, %c0_0] : memref<152x112xbf16, #tpu.memory_space<vmem>>, vector<152x112xbf16>
    %c0_1 = arith.constant 0 : index
    %c0_2 = arith.constant 0 : index
    %1 = vector.load %arg2[%c0_1, %c0_2] : memref<112x112xbf16, #tpu.memory_space<vmem>>, vector<112x112xbf16>
    %cst = arith.constant dense<0.000000e+00> : vector<152x112xf32>
    %2 = tpu.matmul %0, %1, %cst {dimension_numbers = #tpu.dot_dimension_numbers<[1], [0], [0], [1], [0, 0, 1, 1], [], []>} : vector<152x112xbf16>, vector<112x112xbf16>, vector<152x112xf32> -> vector<152x112xf32>
    %c0_3 = arith.constant 0 : index
    %c0_4 = arith.constant 0 : index
    %3 = vector.load %arg3[%c0_3, %c0_4] : memref<1x112xf32, #tpu.memory_space<vmem>>, vector<1x112xf32>
    %4 = vector.broadcast %3 : vector<1x112xf32> to vector<152x112xf32>
    %5 = arith.addf %2, %4 : vector<152x112xf32>
    %6 = arith.truncf %5 : vector<152x112xf32> to vector<152x112xbf16>
    %c0_5 = arith.constant 0 : index
    %c0_6 = arith.constant 0 : index
    %7 = vector.load %arg4[%c0_5, %c0_6] : memref<152x112xbf16, #tpu.memory_space<vmem>>, vector<152x112xbf16>
    tpu.vector_store %arg4[%c0_5, %c0_6], %6 {strides = array<i32>} : memref<152x112xbf16, #tpu.memory_space<vmem>>, vector<152x112xbf16>,
    return
  }
  func.func @transform_0(%arg0: i32) -> (i32, i32) {
    %c0_i32 = arith.constant 0 : i32
    %c0_i32_0 = arith.constant 0 : i32
    return %arg0, %c0_i32 : i32, i32
  }
  func.func @transform_1(%arg0: i32) -> (i32, i32) {
    %c0_i32 = arith.constant 0 : i32
    %c0_i32_0 = arith.constant 0 : i32
    %c0_i32_1 = arith.constant 0 : i32
    return %c0_i32, %c0_i32_0 : i32, i32
  }
  func.func @transform_2(%arg0: i32) -> (i32, i32) {
    %c0_i32 = arith.constant 0 : i32
    %c0_i32_0 = arith.constant 0 : i32
    %c0_i32_1 = arith.constant 0 : i32
    return %c0_i32, %c0_i32_0 : i32, i32
  }
  func.func @transform_3(%arg0: i32) -> (i32, i32) {
    %c0_i32 = arith.constant 0 : i32
    %c0_i32_0 = arith.constant 0 : i32
    return %arg0, %c0_i32 : i32, i32
  }
}

</mosaic_0001>

<bundles_post_ra>
// kernel: tpu_custom_call.1
= control target key start
LH: loop header
LB: loop body
LE: loop exit
PB: predicated region body
PF: predicated region fallthrough
CT: control target
= control target key end

     0   :  { %8 = vsyncpa [#allocation3], 0  ;;  %s1352_s0 = inlined_call_operand.hbm [shape: bf16[300,112], index: 0, kind: input, shape index: {}]   ;;  %s1353_s1 = inlined_call_operand.hbm [shape: bf16[112,112], index: 1, kind: input, shape index: {}]   ;;  %s1354_s2 = inlined_call_operand.vmem [shape: f32[1,112], index: 2, kind: input, shape index: {}]   ;;  %s1355_s3 = inlined_call_operand.hbm [shape: bf16[300,112], index: 3, kind: output, shape index: {}]  }
   0x1   :  { %10 = vsyncpa [#allocation3 + $0x1], 0 }
   0x2   :  { %11 = vsyncpa [#allocation6], 0 }
   0x3   :  { %12 = vsyncpa [#allocation4], 0 }
   0x4   :  { %14 = vsyncpa [#allocation4 + $0x1], 0  ;;  %s1054_s12 = smov 0   ;;  %s1056_s13 = smov 0  }
   0x5   :  { %s1058_s14 = smov 0   ;;  %s1060_s15 = smov 0  }
   0x6 LB: > { %s1075_s16 = sadd.s32 4294967295, %s1025_s15   ;;  %s674_s17 = sadd.s32 4294967294, %s1025_s15   ;;  %s1025_s15 = sphi %s1060_s15, %s1375_s15   ;;  %s1021_s14 = sphi %s1058_s14, %s1374_s14   ;;  %s1017_s13 = sphi %s1056_s13, %s1373_s13   ;;  %s1013_s12 = sphi %s1054_s12, %s1372_s12  }
   0x7   : > { %p40_p0 = scmp.ne.s32.totalorder %s1017_s13, %s1013_s12  ;;  %p1356_p1 = scmp.eq.s32.totalorder %s1075_s16, 0 }
   0x8   : > { %p112_p3 = scmp.eq.s32.totalorder %s674_s17, 1  ;;  %p675_p5 = scmp.ge.s32.totalorder %s1025_s15, 1 }
   0x9   : > { %p1084_p4 = por %p1356_p1, %p40_p0  ;;  %p119_p7 = scmp.lt.s32.totalorder %s1025_s15, 3 }
   0xa   : > { %p1089_p6 = por %p112_p3, %p40_p0  ;;  %s1027_s21 = smov [#allocation5]  }
   0xb   : > { %s1359_s18 = scalar_select %p1084_p4, 1, 0 }
   0xc   : > { %s1360_s19 = scalar_select %p1089_p6, 1, 0 }
   0xd   : > { %p1094_p8 = pnand %p675_p5, %p119_p7  ;;  %s131_s22 = sshll.u32 %s1027_s21, 4  ;;  %s1098_s22 = int_to_ptr.vmem [resolvable:$true] %s131_s22 }
   0xe   : > { %s1110_s24 = sadd.s32 1, %s1025_s15   ;;  %s27_s25 = sadd.s32 1, %s1021_s14 }
   0xf   : > { %s1361_s20 = scalar_select %p1094_p8, 1, 0 }
  0x10   : > { %p827_p9 = pneg %p1094_p8  ;;  %s24_s26 = ssub.s32 %s1025_s15, %s1110_s24 }
  0x11   : > { %s897_s29 = scalar_lea.hbm %s1353_s1, 896 }
  0x12   : > { %p1105_p11 = pnand %p827_p9, %p1356_p1  ;;  %p898_p12 = scmp.ne.s32.totalorder %s1353_s1, %s897_s29 }
  0x13   : > { %p904_p5 = scmp.lt.u32.totalorder %s897_s29, %s1353_s1 }
  0x14   : > { %p899_p13 = pneg %p1105_p11 }
  0x16   : > { %p900_p0 = pnand %p899_p13, %p898_p12 }
  0x18   : > { %p901_p3 = pneg %p900_p0 }
  0x1a   : > { %p906_p7 = pnand %p904_p5, %p901_p3 }
  0x1c   : > { %909 = shalt.err (!%p906_p7)
}
  0x1d   : > { %s910_s7 = scalar_lea.vmem %s1098_s22, 896  ;;  %p918_p2 = scmp.lt.s32.totalorder %s1098_s22, %s1098_s22 }
  0x1e   : > { %p911_p9 = scmp.ne.s32.totalorder %s1098_s22, %s910_s7  ;;  %p919_p6 = scmp.lt.s32.totalorder %s910_s7, %s910_s7 }
  0x20   : > { %p913_p10 = pnand %p911_p9, %p899_p13  ;;  %p920_p4 = por %p919_p6, %p918_p2 }
  0x22   : > { %p914_p1 = pneg %p913_p10 }
  0x24   : > { %p921_p8 = pnand %p920_p4, %p914_p1 }
  0x26   : > { %924 = shalt.err (!%p921_p8)
}
  0x27   : > { %s1028_s8 = smov 64   ;;  %s1029_s9 = smov 4  }
  0x28   : > { %830 = dma.hbm_to_vmem [thread:$0]  (!%p1105_p11), %s1353_s1, 896, %s1098_s22, [#allocation6], %s1028_s8, %s1028_s8, %s1029_s9  }
  0x29   : > { %p25_p1 = scmp.eq.s32.totalorder %s24_s26, 0  ;;  %p34_p2 = scmp.ne.s32.totalorder %s1021_s14, %s1017_s13 }
  0x2a   : > { %p35_p4 = scmp.eq.s32.totalorder %s1025_s15, 0  ;;  %p840_p6 = scmp.lt.s32.totalorder %s1025_s15, 2 }
  0x2b   : > { %s1144_s17 = scalar_select %p25_p1, %s1021_s14, %s27_s25  }
  0x2c   : > { %p36_p8 = por %p35_p4, %p34_p2  ;;  %p1363_p10 = scmp.eq.s32.totalorder %s1075_s16, 1 }
  0x2d   : > { %s148_s23 = sand.u32 1, %s1021_s14   ;;  %s731_s27 = smul.u32 1216, %s1025_s15 }
  0x2e   : > { %p1148_p12 = por %p1363_p10, %p34_p2  ;;  %s817_s28 = smul.u32 76, %s148_s23 }
  0x2f   : > { %p1154_p13 = pnand %p840_p6, %p36_p8  ;;  %s1161_s25 = scalar_lea.hbm %s1352_s0, %s731_s27 }
  0x30   : > { %s152_s30 = scalar_lea.vmem [#allocation2], %s817_s28  ;;  %s1165_s5 = scalar_lea.sflag [#allocation3], %s148_s23 }
  0x31   : > { %s159_s4 = sshll.u32 %s152_s30, 4  ;;  %s925_s6 = scalar_lea.hbm %s1161_s25, 1216  ;;  %s1163_s4 = int_to_ptr.vmem [resolvable:$true] %s159_s4 }
  0x32   : > { %p926_p11 = scmp.ne.s32.totalorder %s1161_s25, %s925_s6  ;;  %p927_p0 = pneg %p1154_p13 }
  0x33   : > { %s930_s11 = scalar_lea.hbm %s1352_s0, 2432  ;;  %p931_p7 = scmp.lt.u32.totalorder %s1161_s25, %s1352_s0 }
  0x34   : > { %p928_p3 = pnand %p927_p0, %p926_p11  ;;  %p932_p9 = scmp.lt.u32.totalorder %s930_s11, %s925_s6 }
  0x35   : > { %p934_p2 = scmp.lt.u32.totalorder %s925_s6, %s1161_s25 }
  0x36   : > { %p929_p5 = pneg %p928_p3  ;;  %p933_p1 = por %p932_p9, %p931_p7 }
  0x38   : > { %p935_p4 = por %p934_p2, %p933_p1 }
  0x3a   : > { %p936_p6 = pnand %p935_p4, %p929_p5 }
  0x3c   : > { %939 = shalt.err (!%p936_p6)
}
  0x3d   : > { %s940_s23 = scalar_lea.vmem %s1163_s4, 1216  ;;  %s1030_s28 = smov [#allocation2]  }
  0x3e   : > { %p941_p8 = scmp.ne.s32.totalorder %s1163_s4, %s940_s23  ;;  %s945_s26 = sshll.u32 %s1030_s28, 4  ;;  %s946_s26 = int_to_ptr.vmem [resolvable:$false] %s945_s26 }
  0x3f   : > { %s947_s30 = scalar_lea.vmem %s946_s26, 2432  ;;  %p948_p3 = scmp.lt.s32.totalorder %s1163_s4, %s946_s26 }
  0x40   : > { %p943_p10 = pnand %p941_p8, %p927_p0  ;;  %p949_p7 = scmp.lt.s32.totalorder %s947_s30, %s940_s23 }
  0x42   : > { %p944_p11 = pneg %p943_p10  ;;  %p950_p9 = por %p949_p7, %p948_p3 }
  0x44   : > { %p951_p1 = pnand %p950_p9, %p944_p11 }
  0x46   : > { %954 = shalt.err (!%p951_p1)
}
  0x47   : > { %834 = dma.hbm_to_vmem [thread:$0]  (!%p1154_p13), %s1161_s25, 1216, %s1163_s4, %s1165_s5, %s1028_s8, %s1028_s8, %s1029_s9  }
  0x48   : > { %p1366_p0 = scmp.ne.s32.totalorder %s1361_s20, 0 }
  0x49   : > { %s1199_s6 = sand.u32 (!%p1366_p0), 1, %s1017_s13   ;;  %p1367_p5 = scmp.ne.s32.totalorder (!%p1366_p0), %s1359_s18, 0 }
  0x4a   : > { %171 = sbr.rel (%p1366_p0) target bundleno = 364 (0x16c), region = 32  ;;  %s174_s10 = scalar_lea.sflag (!%p1366_p0), [#allocation3], %s1199_s6 }
  0x4b   : > { %s818_s7 = smul.u32 (!%p1366_p0), 76, %s1199_s6 }
  0x4d   : > { %s1205_s29 = scalar_lea.vmem (!%p1366_p0), [#allocation2], %s818_s7 }
  0x51   : > { %1000 = dma.done.wait (%p1367_p5), %s174_s10, 1216  }
  0x52   : > { %1002 = vsyncadd (%p1367_p5), %s174_s10, 4294966080  ;;  %p1368_p13 = scmp.eq.s32.totalorder %s1075_s16, 0 }
  0x54   : > { %1004 = dma.done.wait (%p1368_p13), [#allocation6], 896   ;;  %p1369_p2 = pmov %p1368_p13 }
  0x55   : > { %v880_v0 = vld [vmem:[#allocation5] sm:$0xff]   ;;  %v881_v1 = vld [vmem:[#allocation5 + $0x8] sm:$0xff]   ;;  %v882_v2 = vld [vmem:[#allocation5 + $0x10] sm:$0xff]   ;;  %vm337_vm0 = vcmask 916480   ;;  %vm557_vm1 = vcmask 912384   ;;  %s1250_s8 = scalar_lea.vmem [#allocation7], %s818_s7 }
  0x56   : > { %1006 = vsyncadd (%p1369_p2), [#allocation6], 4294966400  ;;  %769 = vmatprep.subr.bf16.mxu0 %v880_v0  ;;  %803 = vmatprep.subr.bf16.mxu1 %v880_v0  ;;  %v887_v3 = vld [vmem:[%s1205_s29] sm:$0xff]   ;;  %v889_v5 = vld [vmem:[%s1205_s29 + $0x30] sm:$0xff]   ;;  %s751_s9 = smul.u32 1216, %s1075_s16  ;;  %s591_s25 = sshll.u32 %s1250_s8, 4  ;;  %s1302_s25 = int_to_ptr.vmem [resolvable:$true] %s591_s25 }
  0x57   : > { %770 = vmatpush3.bf16.msra.mxu0 %v880_v0  ;;  %810 = vmatpush3.bf16.msra.mxu1 %v880_v0  ;;  %v883_v4 = vld [vmem:[#allocation5 + $0x18] sm:$0xff]   ;;  %v884_v6 = vld [vmem:[#allocation5 + $0x20] sm:$0xff]   ;;  %v885_v7 = vld [vmem:[#allocation5 + $0x28] sm:$0xff]   ;;  %s578_s11 = scalar_lea.sflag [#allocation4], %s1199_s6  ;;  %s955_s27 = scalar_lea.vmem %s1302_s25, 1216 }
  0x58   : > { %771 = vmatprep.subr.bf16.mxu0 %v881_v1  ;;  %804 = vmatprep.subr.bf16.mxu1 %v881_v1  ;;  %v886_v8 = vld [vmem:[#allocation5 + $0x30] sm:$0xff]   ;;  %v891_v11 = vld [vmem:[%s1205_s29 + $0x10] sm:$0xff]   ;;  %s1300_s16 = scalar_lea.hbm %s1355_s3, %s751_s9  ;;  %p956_p4 = scmp.ne.s32.totalorder %s1302_s25, %s955_s27 }
  0x59   : > { %783 = vmatprep.mubr.msk.bf16.mxu0 %vm337_vm0, %v887_v3  ;;  %795 = vmatprep.mubr.msk.bf16.mxu1 %vm337_vm0, %v889_v5  ;;  %v888_v9 = vld [vmem:[%s1205_s29 + $0x8] sm:$0xff]   ;;  %v890_v10 = vld [vmem:[%s1205_s29 + $0x38] sm:$0xff]   ;;  %v893_v12 = vld [vmem:[%s1205_s29 + $0x40] sm:$0xff]   ;;  %s1031_s22 = smov [#allocation7]  }
  0x5a   : > { %v892_v13 = vld [vmem:[%s1205_s29 + $0x18] sm:$0xff]   ;;  %v894_v14 = vld [vmem:[%s1205_s29 + $0x48] ss:$0 sps:$4 sm:$0xff]   ;;  %v895_v15 = vld [vmem:[%s1205_s29 + $0x20] sm:$0xff]   ;;  %p957_p6 = pnand %p956_p4, %p1148_p12  ;;  %s959_s23 = sshll.u32 %s1031_s22, 4  ;;  %s960_s23 = int_to_ptr.vmem [resolvable:$false] %s959_s23 }
  0x5b   : > { %772 = vmatpush3.bf16.msra.mxu0 %v881_v1  ;;  %811 = vmatpush3.bf16.msra.mxu1 %v881_v1  ;;  %v896_v16 = vld [vmem:[%s1205_s29 + $0x28] sm:$0xff]   ;;  %v1238_v17 = vld [vmem:[%s1354_s2] ss:$0 sm:$0xff]  ;;  %s961_s28 = scalar_lea.vmem %s960_s23, 2432  ;;  %p962_p10 = scmp.lt.s32.totalorder %s1302_s25, %s960_s23 }
  0x5c   : > { %773 = vmatprep.subr.bf16.mxu0 %v882_v2  ;;  %805 = vmatprep.subr.bf16.mxu1 %v882_v2  ;;  %p958_p8 = pneg %p957_p6  ;;  %p963_p11 = scmp.lt.s32.totalorder %s961_s28, %s955_s27 }
  0x5e   : > { %p964_p3 = por %p963_p11, %p962_p10 }
  0x5f   : > { %774 = vmatpush3.bf16.msra.mxu0 %v882_v2  ;;  %812 = vmatpush3.bf16.msra.mxu1 %v882_v2 }
  0x60   : > { %775 = vmatprep.subr.bf16.mxu0 %v883_v4  ;;  %806 = vmatprep.subr.bf16.mxu1 %v883_v4  ;;  %p965_p7 = pnand %p964_p3, %p958_p8 }
  0x63   : > { %776 = vmatpush3.bf16.msra.mxu0 %v883_v4  ;;  %813 = vmatpush3.bf16.msra.mxu1 %v883_v4 }
  0x64   : > { %777 = vmatprep.subr.bf16.mxu0 %v884_v6  ;;  %807 = vmatprep.subr.bf16.mxu1 %v884_v6 }
  0x67   : > { %778 = vmatpush3.bf16.msra.mxu0 %v884_v6  ;;  %814 = vmatpush3.bf16.msra.mxu1 %v884_v6 }
  0x68   : > { %779 = vmatprep.subr.bf16.mxu0 %v885_v7  ;;  %808 = vmatprep.subr.bf16.mxu1 %v885_v7 }
  0x6b   : > { %780 = vmatpush3.bf16.msra.mxu0 %v885_v7  ;;  %815 = vmatpush3.bf16.msra.mxu1 %v885_v7 }
  0x6c   : > { %781 = vmatprep.subr.bf16.mxu0 %v886_v8  ;;  %809 = vmatprep.subr.bf16.mxu1 %v886_v8 }
  0x6f   : > { %782 = vmatpush3.bf16.msra.mxu0 %v886_v8  ;;  %816 = vmatpush3.bf16.msra.mxu1 %v886_v8 }
  0x72   : > { %784 = vmatmul.mubr.msk.bf16.vlgmr.msra.gmra.mrb[0].mxu0 %vm337_vm0, %v888_v9  ;;  %796 = vmatmul.mubr.msk.bf16.vlgmr.msra.gmra.mrb[0].mxu1 %vm337_vm0, %v890_v10 }
  0x73   : > { %787 = vmatprep.mubr.msk.bf16.mxu0 %vm337_vm0, %v891_v11  ;;  %799 = vmatprep.mubr.msk.bf16.mxu1 %vm337_vm0, %v893_v12 }
  0x7a   : > { %788 = vmatmul.mubr.msk.bf16.gmra.mrb[4].mxu0 %vm337_vm0, %v892_v13  ;;  %800 = vmatmul.mubr.msk.bf16.gmra.mrb[4].mxu1 %vm337_vm0, %v894_v14 }
  0x7b   : > { %791 = vmatprep.mubr.msk.bf16.mxu0 %vm337_vm0, %v895_v15 }
  0x82   : > { %792 = vmatmul.mubr.msk.bf16.gmra.mrb[8].mxu0 %vm337_vm0, %v896_v16 }
 0x145   : > { %v785_v18 = vpop.f32.mrb[0].mxu0  ;;  %v797_v19 = vpop.f32.mrb[0].mxu1 }
 0x146   : > { %v411_v20 = vadd.f32 %v785_v18, %v1238_v17  ;;  %v402_v21 = vpop.f32.mrb[1].mxu0  ;;  %v459_v22 = vadd.f32 %v797_v19, %v1238_v17  ;;  %v450_v23 = vpop.f32.mrb[1].mxu1 }
 0x147   : > { %v403_v24 = vadd.f32 %v1238_v17, %v402_v21  ;;  %v786_v25 = vpop.f32.mrb[2].mxu0  ;;  %v451_v26 = vadd.f32 %v1238_v17, %v450_v23  ;;  %v798_v27 = vpop.f32.mrb[2].mxu1 }
 0x148   : > { %v734_v28 = vpack.c.bf16 %v411_v20, %v411_v20  ;;  %v414_v29 = vadd.f32 %v786_v25, %v1238_v17  ;;  %v405_v30 = vpop.f32.mrb[3].mxu0  ;;  %v746_v31 = vpack.c.bf16 %v459_v22, %v459_v22  ;;  %v462_v32 = vadd.f32 %v798_v27, %v1238_v17  ;;  %v453_v33 = vpop.f32.mrb[3].mxu1 }
 0x149   : > { %v732_v34 = vpack.c.bf16 %v403_v24, %v403_v24  ;;  %v406_v35 = vadd.f32 %v1238_v17, %v405_v30  ;;  %v744_v36 = vpack.c.bf16 %v451_v26, %v451_v26  ;;  %v454_v37 = vadd.f32 %v1238_v17, %v453_v33 }
 0x14a   : > { %560 = vst.msk [vmem:[%s1250_s8 + $0x8] sm:$0xf] %vm557_vm1, %v734_v28  ;;  %v735_v38 = vpack.c.bf16 %v414_v29, %v414_v29  ;;  %572 = vst.msk [vmem:[%s1250_s8 + $0x38] sm:$0xf] %vm557_vm1, %v746_v31  ;;  %v747_v39 = vpack.c.bf16 %v462_v32, %v462_v32 }
 0x14b   : > { %558 = vst.msk [vmem:[%s1250_s8] sm:$0xf] %vm557_vm1, %v732_v34  ;;  %v733_v40 = vpack.c.bf16 %v406_v35, %v406_v35  ;;  %570 = vst.msk [vmem:[%s1250_s8 + $0x30] sm:$0xf] %vm557_vm1, %v744_v36  ;;  %v745_v41 = vpack.c.bf16 %v454_v37, %v454_v37 }
 0x14c   : > { %561 = vst.msk [vmem:[%s1250_s8 + $0xc] sm:$0xf] %vm557_vm1, %v735_v38  ;;  %573 = vst.msk [vmem:[%s1250_s8 + $0x3c] sm:$0xf] %vm557_vm1, %v747_v39 }
 0x14d   : > { %559 = vst.msk [vmem:[%s1250_s8 + $0x4] sm:$0xf] %vm557_vm1, %v733_v40  ;;  %v789_v42 = vpop.f32.mrb[4].mxu0  ;;  %571 = vst.msk [vmem:[%s1250_s8 + $0x34] sm:$0xf] %vm557_vm1, %v745_v41  ;;  %v801_v43 = vpop.f32.mrb[4].mxu1 }
 0x14e   : > { %v427_v44 = vadd.f32 %v789_v42, %v1238_v17  ;;  %v418_v45 = vpop.f32.mrb[5].mxu0  ;;  %v475_v46 = vadd.f32 %v801_v43, %v1238_v17  ;;  %v466_v47 = vpop.f32.mrb[5].mxu1 }
 0x14f   : > { %v419_v48 = vadd.f32 %v1238_v17, %v418_v45  ;;  %v790_v49 = vpop.f32.mrb[6].mxu0  ;;  %v467_v50 = vadd.f32 %v1238_v17, %v466_v47  ;;  %v802_v51 = vpop.f32.mrb[6].mxu1 }
 0x150   : > { %v738_v52 = vpack.c.bf16 %v427_v44, %v427_v44  ;;  %v430_v53 = vadd.f32 %v790_v49, %v1238_v17  ;;  %v421_v54 = vpop.f32.mrb[7].mxu0  ;;  %v750_v55 = vpack.c.bf16 %v475_v46, %v475_v46  ;;  %v469_v56 = vpop.f32.mrb[7].mxu1 }
 0x151   : > { %v736_v57 = vpack.c.bf16 %v419_v48, %v419_v48  ;;  %v422_v58 = vadd.f32 %v1238_v17, %v421_v54  ;;  %v748_v59 = vpack.c.bf16 %v467_v50, %v467_v50  ;;  %v470_v60 = vadd.f32 %v1238_v17, %v469_v56 }
 0x152   : > { %564 = vst.msk [vmem:[%s1250_s8 + $0x18] sm:$0xf] %vm557_vm1, %v738_v52  ;;  %v739_v61 = vpack.c.bf16 %v430_v53, %v430_v53  ;;  %576 = vst.msk [vmem:[%s1250_s8 + $0x48] sm:$0xf] %vm557_vm1, %v750_v55 }
 0x153   : > { %562 = vst.msk [vmem:[%s1250_s8 + $0x10] sm:$0xf] %vm557_vm1, %v736_v57  ;;  %v737_v62 = vpack.c.bf16 %v422_v58, %v422_v58  ;;  %574 = vst.msk [vmem:[%s1250_s8 + $0x40] sm:$0xf] %vm557_vm1, %v748_v59  ;;  %v749_v63 = vpack.c.bf16 %v470_v60, %v470_v60 }
 0x154   : > { %565 = vst.msk [vmem:[%s1250_s8 + $0x1c] sm:$0xf] %vm557_vm1, %v739_v61 }
 0x155   : > { %563 = vst.msk [vmem:[%s1250_s8 + $0x14] sm:$0xf] %vm557_vm1, %v737_v62  ;;  %v793_v0 = vpop.f32.mrb[8].mxu0  ;;  %575 = vst.msk [vmem:[%s1250_s8 + $0x44] sm:$0xf] %vm557_vm1, %v749_v63 }
 0x156   : > { %v443_v1 = vadd.f32 %v793_v0, %v1238_v17  ;;  %v434_v2 = vpop.f32.mrb[9].mxu0 }
 0x157   : > { %v435_v3 = vadd.f32 %v1238_v17, %v434_v2  ;;  %v794_v4 = vpop.f32.mrb[10].mxu0 }
 0x158   : > { %v742_v5 = vpack.c.bf16 %v443_v1, %v443_v1  ;;  %v446_v6 = vadd.f32 %v794_v4, %v1238_v17  ;;  %v437_v7 = vpop.f32.mrb[11].mxu0 }
 0x159   : > { %v740_v8 = vpack.c.bf16 %v435_v3, %v435_v3  ;;  %v438_v9 = vadd.f32 %v1238_v17, %v437_v7 }
 0x15a   : > { %568 = vst.msk [vmem:[%s1250_s8 + $0x28] sm:$0xf] %vm557_vm1, %v742_v5  ;;  %v743_v10 = vpack.c.bf16 %v446_v6, %v446_v6 }
 0x15b   : > { %566 = vst.msk [vmem:[%s1250_s8 + $0x20] sm:$0xf] %vm557_vm1, %v740_v8  ;;  %v741_v11 = vpack.c.bf16 %v438_v9, %v438_v9 }
 0x15c   : > { %569 = vst.msk [vmem:[%s1250_s8 + $0x2c] sm:$0xf] %vm557_vm1, %v743_v10 }
 0x15d   : > { %567 = vst.msk [vmem:[%s1250_s8 + $0x24] sm:$0xf] %vm557_vm1, %v741_v11 }
 0x15e   : > { %968 = shalt.err (!%p965_p7)
}
 0x15f   : > { %s969_s26 = scalar_lea.hbm %s1300_s16, 1216  ;;  %s973_s10 = scalar_lea.hbm %s1355_s3, 2432 }
 0x160   : > { %p970_p9 = scmp.ne.s32.totalorder %s1300_s16, %s969_s26  ;;  %p974_p5 = scmp.lt.u32.totalorder %s1300_s16, %s1355_s3 }
 0x161   : > { %p975_p13 = scmp.lt.u32.totalorder %s973_s10, %s969_s26  ;;  %p977_p4 = scmp.lt.u32.totalorder %s969_s26, %s1300_s16 }
 0x162   : > { %p971_p1 = pnand %p970_p9, %p1148_p12 }
 0x163   : > { %p976_p2 = por %p975_p13, %p974_p5 }
 0x164   : > { %p972_p0 = pneg %p971_p1 }
 0x165   : > { %p978_p6 = por %p977_p4, %p976_p2 }
 0x167   : > { %p979_p8 = pnand %p978_p6, %p972_p0 }
 0x169   : > { %982 = shalt.err (!%p979_p8)
}
 0x16a   : > { %s1032_s20 = smov 64   ;;  %s1033_s8 = smov 4  }
 0x16b   : > { %825 = dma.vmem_to_hbm [thread:$0]  (%p1148_p12), %s1302_s25, 1216, %s1300_s16, %s578_s11, %s1032_s20, %s1032_s20, %s1033_s8  }
 0x16c PF: > { %s606_s9 = sand.u32 1, %s1013_s12   ;;  %p1370_p10 = scmp.ne.s32.totalorder %s1360_s19, 0 }
 0x16d   : > { %p1371_p11 = scmp.ge.s32.totalorder %s1025_s15, 2  ;;  %s607_s4 = scalar_lea.sflag [#allocation4], %s606_s9 }
 0x16f   : > { %p836_p3 = pnand %p1371_p11, %p1370_p10 }
 0x171   : > { %1008 = dma.done.wait (!%p836_p3), %s607_s4, 1216  }
 0x172   : > { %1010 = vsyncadd (!%p836_p3), %s607_s4, 4294966080  ;;  %p17_p7 = scmp.ge.s32.totalorder %s1110_s24, 4   ;;  %s1372_s12 = smov %s1017_s13 }
 0x173   : > { %s1373_s13 = smov %s1021_s14  ;;  %s1374_s14 = smov %s1144_s17 }
 0x174   : > { %s1375_s15 = smov %s1110_s24  ;;  %19 = sbr.rel (!%p17_p7) target bundleno = 6 (0x6), region = 81 }
 0x17b   :  { %612 = vsyncpa [#allocation3], 1 }
 0x17c   :  { %614 = vsyncpa [#allocation3 + $0x1], 1 }
 0x17d   :  { %615 = vsyncpa [#allocation6], 1 }
 0x17e   :  { %616 = vsyncpa [#allocation4], 1 }
 0x17f   :  { %618 = vsyncpa [#allocation4 + $0x1], 1 }

</bundles_post_ra>
